<compile_context>
chip_gen: v7x
topology: tpu7x:2x2x1
jax: 0.10.0
libtpu: 0.0.40
codegen_flags: <defaults>
</compile_context>

<pallas_src>
import functools

import jax
import jax.numpy as jnp
from jax.experimental import pallas as pl
from jax.experimental.pallas import tpu as pltpu


HIDDEN = 512
OUT = 784                      # 28 * 28  (full last dim -> lane-legal block)
TILE_B_MAX = 512               # amortizes ~0.35 us/grid-step overhead
MIN_TILE_B = 8                 # f32 sublane granularity


def _round_up(x, m):
    return ((x + m - 1) // m) * m


def _choose_tile_b(B):
    """Pick batch tile + padded batch. Ensures >= 2 grid steps for v7x megacore
    whenever there is enough work to split."""
    tile_b = min(TILE_B_MAX, _round_up(B, MIN_TILE_B))
    b_pad = _round_up(B, tile_b)
    if b_pad // tile_b < 2 and b_pad >= 4 * MIN_TILE_B:
        tile_b = _round_up(b_pad // 2, MIN_TILE_B)
        b_pad = _round_up(B, tile_b)
    return tile_b, b_pad


def decoder_kernel(z_ref, w1_ref, b1_ref, w2_ref, b2_ref, o_ref):
    # Linear1 (MXU, bf16 in / f32 acc) + bias + ReLU (f32 VPU).
    z = z_ref[...].astype(jnp.bfloat16)
    h = jnp.dot(z, w1_ref[...], preferred_element_type=jnp.float32)
    h = jnp.maximum(h + b1_ref[...], 0.0)                       # F.relu
    # Linear2 (MXU) + bias.
    y = jnp.dot(h.astype(jnp.bfloat16), w2_ref[...],
                preferred_element_type=jnp.float32) + b2_ref[...]
    # torch.sigmoid via the tanh identity: one EUP op, no f32 divide on VPU.
    o_ref[...] = 0.5 * jnp.tanh(0.5 * y) + 0.5


@jax.jit
def decoder_forward(z, w1_bf, b1_f, w2_bf, b2_f):
    """z: (B, latent) f32; params from prepare_params(). -> (B, 1, 28, 28) f32."""
    B, latent = z.shape
    tile_b, b_pad = _choose_tile_b(B)
    if b_pad != B:
        z = jnp.pad(z, ((0, b_pad - B), (0, 0)))

    grid = (b_pad // tile_b,)

    cost = pl.CostEstimate(
        flops=2 * b_pad * (latent * HIDDEN + HIDDEN * OUT),
        transcendentals=b_pad * OUT,                         # tanh (sigmoid)
        bytes_accessed=(b_pad * latent * 4 + w1_bf.size * 2 + w2_bf.size * 2
                        + b1_f.size * 4 + b2_f.size * 4 + b_pad * OUT * 4),
    )

    out_flat = pl.pallas_call(
        decoder_kernel,
        out_shape=jax.ShapeDtypeStruct((b_pad, OUT), jnp.float32),
        grid=grid,
        in_specs=[
            pl.BlockSpec((tile_b, latent), lambda i: (i, 0)),   # z: tiled over B
            pl.BlockSpec((latent, HIDDEN), lambda i: (0, 0)),   # w1: VMEM-resident
            pl.BlockSpec((1, HIDDEN), lambda i: (0, 0)),        # b1: VMEM-resident
            pl.BlockSpec((HIDDEN, OUT), lambda i: (0, 0)),      # w2: VMEM-resident
            pl.BlockSpec((1, OUT), lambda i: (0, 0)),           # b2: VMEM-resident
        ],
        out_specs=pl.BlockSpec((tile_b, OUT), lambda i: (i, 0)),
        compiler_params=pltpu.CompilerParams(
            dimension_semantics=("parallel",),                  # 2-TC shard on v7x
        ),
        cost_estimate=cost,
    )(z, w1_bf, b1_f, w2_bf, b2_f)

    if b_pad != B:
        out_flat = out_flat[:B]
    return out_flat.reshape((-1, 1, 28, 28))


def prepare_params(w1, b1, w2, b2):
    """One-time parameter preprocessing (run at load time, NOT per forward):
    bf16 weight cast for the MXU, f32 biases as (1, N) rows."""
    return (
        jnp.asarray(w1, jnp.bfloat16),
        jnp.asarray(b1, jnp.float32).reshape(1, HIDDEN),
        jnp.asarray(w2, jnp.bfloat16),
        jnp.asarray(b2, jnp.float32).reshape(1, OUT),
    )


def init_params(key, latent_dims):
    """Deterministic synthetic params matching nn.Linear shapes.

    PyTorch stores Linear weight as (out, in); here we keep (in, out) so the
    kernel does z @ W (same math as z @ W_pt.T)."""
    k1, k2, k3, k4 = jax.random.split(key, 4)
    bound1 = 1.0 / jnp.sqrt(latent_dims)
    bound2 = 1.0 / jnp.sqrt(float(HIDDEN))
    w1 = jax.random.uniform(k1, (latent_dims, HIDDEN), jnp.float32, -bound1, bound1)
    b1 = jax.random.uniform(k2, (1, HIDDEN), jnp.float32, -bound1, bound1)
    w2 = jax.random.uniform(k3, (HIDDEN, OUT), jnp.float32, -bound2, bound2)
    b2 = jax.random.uniform(k4, (1, OUT), jnp.float32, -bound2, bound2)
    return w1, b1, w2, b2


if __name__ == "__main__":
    latent_dims = 32
    batch = 8

    key = jax.random.PRNGKey(0)
    kz, kp = jax.random.split(key)
    z = jax.random.normal(kz, (batch, latent_dims), jnp.float32)
    w1, b1, w2, b2 = init_params(kp, latent_dims)

    # One-time prep (outside the per-call forward path).
    w1_bf, b1_f, w2_bf, b2_f = prepare_params(w1, b1, w2, b2)

    out = decoder_forward(z, w1_bf, b1_f, w2_bf, b2_f)
    out = jax.block_until_ready(out)
    assert out.shape == (batch, 1, 28, 28)

    # Reference 1: same bf16-weight math in plain JAX (tight tolerance).
    ref_bf = jax.nn.sigmoid(
        jnp.dot(
            jnp.maximum(
                jnp.dot(z.astype(jnp.bfloat16), w1.astype(jnp.bfloat16),
                        preferred_element_type=jnp.float32) + b1, 0.0
            ).astype(jnp.bfloat16),
            w2.astype(jnp.bfloat16), preferred_element_type=jnp.float32,
        ) + b2
    ).reshape((-1, 1, 28, 28))
    assert jnp.allclose(out, ref_bf, atol=1e-3, rtol=1e-3)

    # Reference 2: full f32 math (looser tolerance due to bf16 weights).
    ref_f32 = jax.nn.sigmoid(
        jnp.maximum(z @ w1 + b1, 0.0) @ w2 + b2
    ).reshape((-1, 1, 28, 28))
    assert jnp.allclose(out, ref_f32, atol=3e-2, rtol=3e-2)

    print("KERNEL_OK")
</pallas_src>

<mosaic_0001>
module attributes {stable_mosaic.version = 11 : i64} {
  func.func @decoder_kernel(%arg0: i32, %arg1: memref<8x32xf32, #tpu.memory_space<vmem>>, %arg2: memref<32x512xbf16, #tpu.memory_space<vmem>>, %arg3: memref<1x512xf32, #tpu.memory_space<vmem>>, %arg4: memref<512x784xbf16, #tpu.memory_space<vmem>>, %arg5: memref<1x784xf32, #tpu.memory_space<vmem>>, %arg6: memref<8x784xf32, #tpu.memory_space<vmem>>) attributes {dimension_semantics = [#tpu.dimension_semantics<parallel>], iteration_bounds = array<i64: 1>, scalar_prefetch = 0 : i64, scratch_operands = 0 : i64, tpu.core_type = #tpu.core_type<tc>, window_params = [{transform_indices = @transform_0, window_bounds = array<i64: 8, 32>}, {pipeline_mode = #tpu.pipeline_mode<synchronous>, transform_indices = @transform_1, window_bounds = array<i64: 32, 512>}, {pipeline_mode = #tpu.pipeline_mode<synchronous>, transform_indices = @transform_2, window_bounds = array<i64: 1, 512>}, {pipeline_mode = #tpu.pipeline_mode<synchronous>, transform_indices = @transform_3, window_bounds = array<i64: 512, 784>}, {pipeline_mode = #tpu.pipeline_mode<synchronous>, transform_indices = @transform_4, window_bounds = array<i64: 1, 784>}, {transform_indices = @transform_5, window_bounds = array<i64: 8, 784>}]} {
    %c0 = arith.constant 0 : index
    %c0_0 = arith.constant 0 : index
    %0 = vector.load %arg1[%c0, %c0_0] : memref<8x32xf32, #tpu.memory_space<vmem>>, vector<8x32xf32>
    %1 = arith.truncf %0 : vector<8x32xf32> to vector<8x32xbf16>
    %c0_1 = arith.constant 0 : index
    %c0_2 = arith.constant 0 : index
    %2 = vector.load %arg2[%c0_1, %c0_2] : memref<32x512xbf16, #tpu.memory_space<vmem>>, vector<32x512xbf16>
    %cst = arith.constant dense<0.000000e+00> : vector<8x512xf32>
    %3 = tpu.matmul %1, %2, %cst {dimension_numbers = #tpu.dot_dimension_numbers<[1], [0], [0], [1], [0, 0, 1, 1], [], []>} : vector<8x32xbf16>, vector<32x512xbf16>, vector<8x512xf32> -> vector<8x512xf32>
    %c0_3 = arith.constant 0 : index
    %c0_4 = arith.constant 0 : index
    %4 = vector.load %arg3[%c0_3, %c0_4] : memref<1x512xf32, #tpu.memory_space<vmem>>, vector<1x512xf32>
    %5 = vector.broadcast %4 : vector<1x512xf32> to vector<8x512xf32>
    %6 = arith.addf %3, %5 : vector<8x512xf32>
    %cst_5 = arith.constant 0.000000e+00 : f32
    %7 = vector.broadcast %cst_5 : f32 to vector<8x512xf32>
    %8 = arith.maximumf %6, %7 : vector<8x512xf32>
    %9 = arith.truncf %8 : vector<8x512xf32> to vector<8x512xbf16>
    %c0_6 = arith.constant 0 : index
    %c0_7 = arith.constant 0 : index
    %10 = vector.load %arg4[%c0_6, %c0_7] : memref<512x784xbf16, #tpu.memory_space<vmem>>, vector<512x784xbf16>
    %cst_8 = arith.constant dense<0.000000e+00> : vector<8x784xf32>
    %11 = tpu.matmul %9, %10, %cst_8 {dimension_numbers = #tpu.dot_dimension_numbers<[1], [0], [0], [1], [0, 0, 1, 1], [], []>} : vector<8x512xbf16>, vector<512x784xbf16>, vector<8x784xf32> -> vector<8x784xf32>
    %c0_9 = arith.constant 0 : index
    %c0_10 = arith.constant 0 : index
    %12 = vector.load %arg5[%c0_9, %c0_10] : memref<1x784xf32, #tpu.memory_space<vmem>>, vector<1x784xf32>
    %13 = vector.broadcast %12 : vector<1x784xf32> to vector<8x784xf32>
    %14 = arith.addf %11, %13 : vector<8x784xf32>
    %cst_11 = arith.constant 5.000000e-01 : f32
    %15 = vector.broadcast %cst_11 : f32 to vector<8x784xf32>
    %16 = arith.mulf %15, %14 : vector<8x784xf32>
    %17 = math.tanh %16 : vector<8x784xf32>
    %cst_12 = arith.constant 5.000000e-01 : f32
    %18 = vector.broadcast %cst_12 : f32 to vector<8x784xf32>
    %19 = arith.mulf %18, %17 : vector<8x784xf32>
    %cst_13 = arith.constant 5.000000e-01 : f32
    %20 = vector.broadcast %cst_13 : f32 to vector<8x784xf32>
    %21 = arith.addf %19, %20 : vector<8x784xf32>
    %c0_14 = arith.constant 0 : index
    %c0_15 = arith.constant 0 : index
    %22 = vector.load %arg6[%c0_14, %c0_15] : memref<8x784xf32, #tpu.memory_space<vmem>>, vector<8x784xf32>
    tpu.vector_store %arg6[%c0_14, %c0_15], %21 {strides = array<i32>} : memref<8x784xf32, #tpu.memory_space<vmem>>, vector<8x784xf32>,
    return
  }
  func.func @transform_0(%arg0: i32) -> (i32, i32) {
    %c0_i32 = arith.constant 0 : i32
    %c0_i32_0 = arith.constant 0 : i32
    return %arg0, %c0_i32 : i32, i32
  }
  func.func @transform_1(%arg0: i32) -> (i32, i32) {
    %c0_i32 = arith.constant 0 : i32
    %c0_i32_0 = arith.constant 0 : i32
    %c0_i32_1 = arith.constant 0 : i32
    return %c0_i32, %c0_i32_0 : i32, i32
  }
  func.func @transform_2(%arg0: i32) -> (i32, i32) {
    %c0_i32 = arith.constant 0 : i32
    %c0_i32_0 = arith.constant 0 : i32
    %c0_i32_1 = arith.constant 0 : i32
    return %c0_i32, %c0_i32_0 : i32, i32
  }
  func.func @transform_3(%arg0: i32) -> (i32, i32) {
    %c0_i32 = arith.constant 0 : i32
    %c0_i32_0 = arith.constant 0 : i32
    %c0_i32_1 = arith.constant 0 : i32
    return %c0_i32, %c0_i32_0 : i32, i32
  }
  func.func @transform_4(%arg0: i32) -> (i32, i32) {
    %c0_i32 = arith.constant 0 : i32
    %c0_i32_0 = arith.constant 0 : i32
    %c0_i32_1 = arith.constant 0 : i32
    return %c0_i32, %c0_i32_0 : i32, i32
  }
  func.func @transform_5(%arg0: i32) -> (i32, i32) {
    %c0_i32 = arith.constant 0 : i32
    %c0_i32_0 = arith.constant 0 : i32
    return %arg0, %c0_i32 : i32, i32
  }
}

</mosaic_0001>

<bundles_post_ra>
// kernel: decoder_forward.1
= control target key start
LH: loop header
LB: loop body
LE: loop exit
PB: predicated region body
PF: predicated region fallthrough
CT: control target
= control target key end

     0   :  { %v2641_v1 = vmov 0   ;;  %vm93_vm0 = vcmask 261120   ;;  %vm1992_vm1 = vcmask 130048   ;;  %s3467_s1 = inlined_call_operand.vmem [shape: bf16[32,512], index: 1, kind: input, shape index: {}]   ;;  %s3468_s0 = inlined_call_operand.vmem [shape: f32[8,32], index: 0, kind: input, shape index: {}]   ;;  %s3469_s3 = inlined_call_operand.vmem [shape: bf16[512,784], index: 3, kind: input, shape index: {}]   ;;  %s3470_s2 = inlined_call_operand.vmem [shape: f32[1,512], index: 2, kind: input, shape index: {}]   ;;  %s3471_s4 = inlined_call_operand.vmem [shape: f32[1,784], index: 4, kind: input, shape index: {}]   ;;  %s3472_s5 = inlined_call_operand.vmem [shape: f32[8,784], index: 5, kind: output, shape index: {}]  }
   0x1   :  { %v2295_v0 = vld [vmem:[%s3467_s1 + $0x4] ss:$16 sps:$4 sm:$0xff]   ;;  %129 = vmatprep.mubr.bf16.mxu1 %v2641_v1  ;;  %v2297_v2 = vld [vmem:[%s3467_s1] ss:$16 sps:$4 sm:$0xff]   ;;  %v2303_v6 = vld [vmem:[%s3467_s1 + $0xc] ss:$16 sps:$4 sm:$0xff]  }
   0x2   :  { %97 = vmatprep.subr.bf16.mxu1 %v2295_v0  ;;  %v2298_v3 = vld [vmem:[%s3467_s1 + $0x24] ss:$16 sps:$4 sm:$0xff]   ;;  %v2300_v4 = vld [vmem:[%s3467_s1 + $0x20] ss:$16 sps:$4 sm:$0xff]   ;;  %v2301_v9 = vld [vmem:[%s3467_s1 + $0x8] ss:$16 sps:$4 sm:$0xff]  }
   0x3   :  { %98 = vmatpush1.bf16.msra.mxu1 %v2297_v2  ;;  %v21_v5 = vld [vmem:[%s3468_s0] sm:$0xff]  ;;  %v2306_v10 = vld [vmem:[%s3467_s1 + $0x2c] ss:$16 sps:$4 sm:$0xff]   ;;  %v2304_v13 = vld [vmem:[%s3467_s1 + $0x28] ss:$16 sps:$4 sm:$0xff]  }
   0x4   :  { %99 = vmatprep.subr.bf16.mxu1 %v2298_v3  ;;  %v22_v7 = vpack.c.bf16 %v21_v5, %v21_v5  ;;  %v2307_v8 = vld [vmem:[%s3469_s3 + $0x4] ss:$28 sps:$4 sm:$0xff]   ;;  %v2313_v12 = vld [vmem:[%s3469_s3 + $0x3c] ss:$28 sps:$4 sm:$0xff]   ;;  %v2319_v15 = vld [vmem:[%s3469_s3 + $0x74] ss:$28 sps:$4 sm:$0xff]  }
   0x5   :  { %1632 = vmatprep.subr.bf16.mxu0 %v2307_v8  ;;  %v2312_v11 = vld [vmem:[%s3469_s3] ss:$28 sps:$4 sm:$0xff]   ;;  %v2318_v14 = vld [vmem:[%s3469_s3 + $0x38] ss:$28 sps:$4 sm:$0xff]   ;;  %v2311_v16 = vld [vmem:[%s3469_s3 + $0xc] ss:$28 sps:$4 sm:$0xff]  }
   0x6   :  { %1633 = vmatpush1.bf16.msra.mxu0 %v2312_v11  ;;  %v2324_v17 = vld [vmem:[%s3469_s3 + $0x70] ss:$28 sps:$4 sm:$0xff]   ;;  %v2309_v18 = vld [vmem:[%s3469_s3 + $0x8] ss:$28 sps:$4 sm:$0xff]   ;;  %v2315_v21 = vld [vmem:[%s3469_s3 + $0x40] ss:$28 sps:$4 sm:$0xff]  }
   0x7   :  { %100 = vmatpush1.bf16.msra.mxu1 %v2300_v4  ;;  %1634 = vmatprep.subr.bf16.mxu0 %v2313_v12  ;;  %v2325_v19 = vld [vmem:[%s3469_s3 + $0xac] ss:$28 sps:$4 sm:$0xff]   ;;  %v2317_v20 = vld [vmem:[%s3469_s3 + $0x44] ss:$28 sps:$4 sm:$0xff]   ;;  %v2323_v24 = vld [vmem:[%s3469_s3 + $0x7c] ss:$28 sps:$4 sm:$0xff]  }
   0x8   :  { %138 = vmatprep.subr.bf16.mxu1 %v2303_v6  ;;  %v2330_v22 = vld [vmem:[%s3469_s3 + $0xa8] ss:$28 sps:$4 sm:$0xff]   ;;  %v2336_v25 = vld [vmem:[%s3469_s3 + $0xe0] ss:$28 sps:$4 sm:$0xff]   ;;  %v2321_v26 = vld [vmem:[%s3469_s3 + $0x78] ss:$28 sps:$4 sm:$0xff]  }
   0x9   :  { %v2331_v23 = vld [vmem:[%s3469_s3 + $0xe4] ss:$28 sps:$4 sm:$0xff]   ;;  %v2337_v27 = vld [vmem:[%s3469_s3 + $0x11c] ss:$28 sps:$4 sm:$0xff]   ;;  %v2329_v28 = vld [vmem:[%s3469_s3 + $0xb4] ss:$28 sps:$4 sm:$0xff]  }
   0xa   :  { %2006 = vmatmul.mubr.msk.bf16.vlgmr.msra.gmra.mrb[0].mxu1 %vm93_vm0, %v22_v7  ;;  %1635 = vmatpush1.bf16.msra.mxu0 %v2318_v14  ;;  %v2327_v29 = vld [vmem:[%s3469_s3 + $0xb0] ss:$28 sps:$4 sm:$0xff]   ;;  %v2342_v30 = vld [vmem:[%s3469_s3 + $0x118] ss:$28 sps:$4 sm:$0xff]   ;;  %v2333_v34 = vld [vmem:[%s3469_s3 + $0xe8] ss:$28 sps:$4 sm:$0xff]  }
   0xb   :  { %139 = vmatpush1.bf16.msra.mxu1 %v2301_v9  ;;  %170 = vmatprep.mubr.bf16.mxu1 %v2641_v1  ;;  %v2343_v31 = vld [vmem:[%s3469_s3 + $0x154] ss:$28 sps:$4 sm:$0xff]   ;;  %v2335_v32 = vld [vmem:[%s3469_s3 + $0xec] ss:$28 sps:$4 sm:$0xff]   ;;  %v2341_v36 = vld [vmem:[%s3469_s3 + $0x124] ss:$28 sps:$4 sm:$0xff]  }
   0xc   :  { %140 = vmatprep.subr.bf16.mxu1 %v2306_v10  ;;  %1636 = vmatprep.subr.bf16.mxu0 %v2319_v15  ;;  %v2348_v33 = vld [vmem:[%s3469_s3 + $0x150] ss:$28 sps:$4 sm:$0xff]   ;;  %v2339_v37 = vld [vmem:[%s3469_s3 + $0x120] ss:$28 sps:$4 sm:$0xff]   ;;  %v2354_v38 = vld [vmem:[%s3469_s3 + $0x188] ss:$28 sps:$4 sm:$0xff]  }
   0xd   :  { %v2349_v35 = vld [vmem:[%s3469_s3 + $0x18c] ss:$28 sps:$4 sm:$0xff]   ;;  %v2355_v39 = vld [vmem:[%s3469_s3 + $0x1c4] ss:$28 sps:$4 sm:$0xff]   ;;  %v2347_v40 = vld [vmem:[%s3469_s3 + $0x15c] ss:$28 sps:$4 sm:$0xff]  }
   0xe   :  { %1637 = vmatpush1.bf16.msra.mxu0 %v2324_v17  ;;  %v2360_v41 = vld [vmem:[%s3469_s3 + $0x1c0] ss:$28 sps:$4 sm:$0xff]   ;;  %v2345_v42 = vld [vmem:[%s3469_s3 + $0x158] ss:$28 sps:$4 sm:$0xff]   ;;  %v2351_v45 = vld [vmem:[%s3469_s3 + $0x190] ss:$28 sps:$4 sm:$0xff]  }
   0xf   :  { %141 = vmatpush1.bf16.msra.mxu1 %v2304_v13  ;;  %1638 = vmatprep.subr.bf16.mxu0 %v2325_v19  ;;  %v2361_v43 = vld [vmem:[%s3469_s3 + $0x1fc] ss:$28 sps:$4 sm:$0xff]   ;;  %v2353_v44 = vld [vmem:[%s3469_s3 + $0x194] ss:$28 sps:$4 sm:$0xff]   ;;  %v2359_v46 = vld [vmem:[%s3469_s3 + $0x1cc] ss:$28 sps:$4 sm:$0xff]   ;;  %v33_v13 = vlaneseq }
  0x10   :  { %1714 = vmatprep.subr.bf16.mxu1 %v2311_v16  ;;  %v2366_v47 = vld [vmem:[%s3469_s3 + $0x1f8] ss:$28 sps:$4 sm:$0xff]   ;;  %v2372_v49 = vld [vmem:[%s3469_s3 + $0x230] ss:$28 sps:$4 sm:$0xff]   ;;  %v2357_v50 = vld [vmem:[%s3469_s3 + $0x1c8] ss:$28 sps:$4 sm:$0xff]  }
  0x11   :  { %v2367_v48 = vld [vmem:[%s3469_s3 + $0x234] ss:$28 sps:$4 sm:$0xff]   ;;  %v2373_v51 = vld [vmem:[%s3469_s3 + $0x26c] ss:$28 sps:$4 sm:$0xff]   ;;  %v2365_v52 = vld [vmem:[%s3469_s3 + $0x204] ss:$28 sps:$4 sm:$0xff]  }
  0x12   :  { %2007 = vmatmul.mubr.msk.bf16.vlgmr.msra.gmra.mrb[4].mxu1 %vm93_vm0, %v22_v7  ;;  %1639 = vmatpush1.bf16.msra.mxu0 %v2330_v22  ;;  %v2378_v53 = vld [vmem:[%s3469_s3 + $0x268] ss:$28 sps:$4 sm:$0xff]   ;;  %v2363_v54 = vld [vmem:[%s3469_s3 + $0x200] ss:$28 sps:$4 sm:$0xff]   ;;  %v2369_v58 = vld [vmem:[%s3469_s3 + $0x238] ss:$28 sps:$4 sm:$0xff]  }
  0x13   :  { %1715 = vmatpush1.bf16.msra.mxu1 %v2309_v18  ;;  %1640 = vmatprep.subr.bf16.mxu0 %v2331_v23  ;;  %v2379_v55 = vld [vmem:[%s3469_s3 + $0x2a4] ss:$28 sps:$4 sm:$0xff]   ;;  %v2371_v56 = vld [vmem:[%s3469_s3 + $0x23c] ss:$28 sps:$4 sm:$0xff]   ;;  %v2377_v60 = vld [vmem:[%s3469_s3 + $0x274] ss:$28 sps:$4 sm:$0xff]  }
  0x14   :  { %1716 = vmatprep.subr.bf16.mxu1 %v2317_v20  ;;  %v2384_v57 = vld [vmem:[%s3469_s3 + $0x2a0] ss:$28 sps:$4 sm:$0xff]   ;;  %v2390_v61 = vld [vmem:[%s3469_s3 + $0x2d8] ss:$28 sps:$4 sm:$0xff]   ;;  %v2375_v62 = vld [vmem:[%s3469_s3 + $0x270] ss:$28 sps:$4 sm:$0xff]  }
  0x15   :  { %v2385_v59 = vld [vmem:[%s3469_s3 + $0x2dc] ss:$28 sps:$4 sm:$0xff]   ;;  %v2383_v63 = vld [vmem:[%s3469_s3 + $0x2ac] ss:$28 sps:$4 sm:$0xff]   ;;  %v2389_v1 = vld [vmem:[%s3469_s3 + $0x2e4] ss:$28 sps:$4 sm:$0xff]  }
  0x16   :  { %1641 = vmatpush1.bf16.msra.mxu0 %v2336_v25  ;;  %v2381_v0 = vld [vmem:[%s3469_s3 + $0x2a8] ss:$28 sps:$4 sm:$0xff]   ;;  %v2387_v2 = vld [vmem:[%s3469_s3 + $0x2e0] ss:$28 sps:$4 sm:$0xff]   ;;  %v2391_v3 = vld [vmem:[%s3469_s3 + $0x314] ss:$28 sps:$4 sm:$0xff]  }
  0x17   :  { %1717 = vmatpush1.bf16.msra.mxu1 %v2315_v21  ;;  %1642 = vmatprep.subr.bf16.mxu0 %v2337_v27  ;;  %v2395_v4 = vld [vmem:[%s3469_s3 + $0x31c] ss:$28 sps:$4 sm:$0xff]   ;;  %v2396_v6 = vld [vmem:[%s3469_s3 + $0x310] ss:$28 sps:$4 sm:$0xff]   ;;  %v2402_v10 = vld [vmem:[%s3469_s3 + $0x348] ss:$28 sps:$4 sm:$0xff]  }
  0x18   :  { %1718 = vmatprep.subr.bf16.mxu1 %v2323_v24  ;;  %v2393_v5 = vld [vmem:[%s3469_s3 + $0x318] ss:$28 sps:$4 sm:$0xff]   ;;  %v2397_v7 = vld [vmem:[%s3469_s3 + $0x34c] ss:$28 sps:$4 sm:$0xff]   ;;  %v2405_v11 = vld [vmem:[%s3469_s3 + $0x384] ss:$28 sps:$4 sm:$0xff]  }
  0x19   :  { %v2401_v8 = vld [vmem:[%s3469_s3 + $0x354] ss:$28 sps:$4 sm:$0xff]   ;;  %v2408_v12 = vld [vmem:[%s3469_s3 + $0x38c] ss:$28 sps:$4 sm:$0xff]   ;;  %v2899_v14 = vshrl.u32 %v33_v13, 7 }
  0x1a   :  { %1643 = vmatpush1.bf16.msra.mxu0 %v2342_v30  ;;  %v2399_v9 = vld [vmem:[%s3469_s3 + $0x350] ss:$28 sps:$4 sm:$0xff]   ;;  %v2905_v16 = vld [vmem:[%s3470_s2] sm:$0xf] }
  0x1b   :  { %1719 = vmatpush1.bf16.msra.mxu1 %v2321_v26  ;;  %1644 = vmatprep.subr.bf16.mxu0 %v2343_v31  ;;  %v35_v15 = vsub.s32 0, %v2899_v14  ;;  %v39_v17 = vsub.s32 1, %v2899_v14  ;;  %v47_v25 = vsub.s32 3, %v2899_v14  ;;  %v2403_v30 = vld [vmem:[%s3469_s3 + $0x380] ss:$28 sps:$4 sm:$0xff]  }
  0x1c   :  { %1720 = vmatprep.subr.bf16.mxu1 %v2329_v28  ;;  %v2406_v31 = vld [vmem:[%s3469_s3 + $0x388] ss:$28 sps:$4 sm:$0xff]   ;;  %v2465_v13 = vld [vmem:[%s3469_s3 + $0x5b4] ss:$28 sps:$4 sm:$0xff]  }
  0x1d   :  { %v36_v18 = vrot.slane %v2905_v16, %v35_v15  ;;  %v40_v19 = vrot.slane %v2905_v16, %v39_v17 }
  0x1e   :  { %1645 = vmatpush1.bf16.msra.mxu0 %v2348_v33 }
  0x1f   :  { %1721 = vmatpush1.bf16.msra.mxu1 %v2327_v29  ;;  %1646 = vmatprep.subr.bf16.mxu0 %v2349_v35  ;;  %v2414_v35 = vld [vmem:[%s3469_s3 + $0x3c4] ss:$28 sps:$4 sm:$0xff]  }
  0x20   :  { %1722 = vmatprep.subr.bf16.mxu1 %v2335_v32  ;;  %v48_v32 = vrot.slane %v2905_v16, %v47_v25 }
  0x22   :  { %1647 = vmatpush1.bf16.msra.mxu0 %v2354_v38  ;;  %v2409_v38 = vld [vmem:[%s3469_s3 + $0x3b8] ss:$28 sps:$4 sm:$0xff]  }
  0x23   :  { %1723 = vmatpush1.bf16.msra.mxu1 %v2333_v34  ;;  %1648 = vmatprep.subr.bf16.mxu0 %v2355_v39  ;;  %v2411_v34 = vld [vmem:[%s3469_s3 + $0x3bc] ss:$28 sps:$4 sm:$0xff]  }
  0x24   :  { %1724 = vmatprep.subr.bf16.mxu1 %v2341_v36  ;;  %v2412_v39 = vld [vmem:[%s3469_s3 + $0x3c0] ss:$28 sps:$4 sm:$0xff]  }
  0x26   :  { %1649 = vmatpush1.bf16.msra.mxu0 %v2360_v41 }
  0x27   :  { %1725 = vmatpush1.bf16.msra.mxu1 %v2339_v37  ;;  %1650 = vmatprep.subr.bf16.mxu0 %v2361_v43  ;;  %v2420_v43 = vld [vmem:[%s3469_s3 + $0x3fc] ss:$28 sps:$4 sm:$0xff]  }
  0x28   :  { %1726 = vmatprep.subr.bf16.mxu1 %v2347_v40 }
  0x2a   :  { %1651 = vmatpush1.bf16.msra.mxu0 %v2366_v47  ;;  %v2418_v47 = vld [vmem:[%s3469_s3 + $0x3f8] ss:$28 sps:$4 sm:$0xff]  }
  0x2b   :  { %1727 = vmatpush1.bf16.msra.mxu1 %v2345_v42  ;;  %1652 = vmatprep.subr.bf16.mxu0 %v2367_v48  ;;  %v2417_v42 = vld [vmem:[%s3469_s3 + $0x3f4] ss:$28 sps:$4 sm:$0xff]  }
  0x2c   :  { %1728 = vmatprep.subr.bf16.mxu1 %v2353_v44 }
  0x2e   :  { %1653 = vmatpush1.bf16.msra.mxu0 %v2372_v49  ;;  %v2423_v49 = vld [vmem:[%s3469_s3 + $0x42c] ss:$28 sps:$4 sm:$0xff]  }
  0x2f   :  { %1729 = vmatpush1.bf16.msra.mxu1 %v2351_v45  ;;  %1654 = vmatprep.subr.bf16.mxu0 %v2373_v51  ;;  %v2421_v51 = vld [vmem:[%s3469_s3 + $0x428] ss:$28 sps:$4 sm:$0xff]  }
  0x30   :  { %1730 = vmatprep.subr.bf16.mxu1 %v2359_v46  ;;  %v2415_v46 = vld [vmem:[%s3469_s3 + $0x3f0] ss:$28 sps:$4 sm:$0xff]  }
  0x32   :  { %1655 = vmatpush1.bf16.msra.mxu0 %v2378_v53  ;;  %v2429_v53 = vld [vmem:[%s3469_s3 + $0x464] ss:$28 sps:$4 sm:$0xff]  }
  0x33   :  { %1731 = vmatpush1.bf16.msra.mxu1 %v2357_v50  ;;  %1656 = vmatprep.subr.bf16.mxu0 %v2379_v55  ;;  %v2426_v50 = vld [vmem:[%s3469_s3 + $0x434] ss:$28 sps:$4 sm:$0xff]   ;;  %v2427_v55 = vld [vmem:[%s3469_s3 + $0x460] ss:$28 sps:$4 sm:$0xff]  }
  0x34   :  { %1732 = vmatprep.subr.bf16.mxu1 %v2365_v52  ;;  %v2424_v52 = vld [vmem:[%s3469_s3 + $0x430] ss:$28 sps:$4 sm:$0xff]  }
  0x36   :  { %1657 = vmatpush1.bf16.msra.mxu0 %v2384_v57  ;;  %v2435_v57 = vld [vmem:[%s3469_s3 + $0x49c] ss:$28 sps:$4 sm:$0xff]  }
  0x37   :  { %1733 = vmatpush1.bf16.msra.mxu1 %v2363_v54  ;;  %1658 = vmatprep.subr.bf16.mxu0 %v2385_v59  ;;  %v2432_v54 = vld [vmem:[%s3469_s3 + $0x46c] ss:$28 sps:$4 sm:$0xff]   ;;  %v2433_v59 = vld [vmem:[%s3469_s3 + $0x498] ss:$28 sps:$4 sm:$0xff]  }
  0x38   :  { %1734 = vmatprep.subr.bf16.mxu1 %v2371_v56  ;;  %v2430_v56 = vld [vmem:[%s3469_s3 + $0x468] ss:$28 sps:$4 sm:$0xff]  }
  0x3a   :  { %1659 = vmatpush1.bf16.msra.mxu0 %v2390_v61  ;;  %v2441_v61 = vld [vmem:[%s3469_s3 + $0x4d4] ss:$28 sps:$4 sm:$0xff]  }
  0x3b   :  { %1735 = vmatpush1.bf16.msra.mxu1 %v2369_v58  ;;  %1660 = vmatprep.subr.bf16.mxu0 %v2391_v3  ;;  %v2438_v58 = vld [vmem:[%s3469_s3 + $0x4a4] ss:$28 sps:$4 sm:$0xff]  }
  0x3c   :  { %1736 = vmatprep.subr.bf16.mxu1 %v2377_v60  ;;  %v2436_v60 = vld [vmem:[%s3469_s3 + $0x4a0] ss:$28 sps:$4 sm:$0xff]   ;;  %v2445_v3 = vld [vmem:[%s3469_s3 + $0x508] ss:$28 sps:$4 sm:$0xff]  }
  0x3e   :  { %1661 = vmatpush1.bf16.msra.mxu0 %v2396_v6  ;;  %v2456_v6 = vld [vmem:[%s3469_s3 + $0x54c] ss:$28 sps:$4 sm:$0xff]  }
  0x3f   :  { %1737 = vmatpush1.bf16.msra.mxu1 %v2375_v62  ;;  %1662 = vmatprep.subr.bf16.mxu0 %v2397_v7  ;;  %v2444_v62 = vld [vmem:[%s3469_s3 + $0x4dc] ss:$28 sps:$4 sm:$0xff]  }
  0x40   :  { %1738 = vmatprep.subr.bf16.mxu1 %v2383_v63  ;;  %v2439_v63 = vld [vmem:[%s3469_s3 + $0x4d0] ss:$28 sps:$4 sm:$0xff]   ;;  %v2451_v7 = vld [vmem:[%s3469_s3 + $0x540] ss:$28 sps:$4 sm:$0xff]  }
  0x42   :  { %1663 = vmatpush1.bf16.msra.mxu0 %v2402_v10  ;;  %v2462_v10 = vld [vmem:[%s3469_s3 + $0x584] ss:$28 sps:$4 sm:$0xff]  }
  0x43   :  { %1739 = vmatpush1.bf16.msra.mxu1 %v2381_v0  ;;  %1673 = vmatprep.subr.bf16.mxu0 %v2405_v11  ;;  %v2442_v0 = vld [vmem:[%s3469_s3 + $0x4d8] ss:$28 sps:$4 sm:$0xff]  }
  0x44   :  { %1740 = vmatprep.subr.bf16.mxu1 %v2389_v1  ;;  %v2447_v1 = vld [vmem:[%s3469_s3 + $0x50c] ss:$28 sps:$4 sm:$0xff]   ;;  %v2457_v11 = vld [vmem:[%s3469_s3 + $0x578] ss:$28 sps:$4 sm:$0xff]  }
  0x47   :  { %1741 = vmatpush1.bf16.msra.mxu1 %v2387_v2  ;;  %v2450_v2 = vld [vmem:[%s3469_s3 + $0x514] ss:$28 sps:$4 sm:$0xff]  }
  0x48   :  { %1742 = vmatprep.subr.bf16.mxu1 %v2395_v4  ;;  %v2448_v4 = vld [vmem:[%s3469_s3 + $0x510] ss:$28 sps:$4 sm:$0xff]  }
  0x4b   :  { %1743 = vmatpush1.bf16.msra.mxu1 %v2393_v5  ;;  %v2453_v5 = vld [vmem:[%s3469_s3 + $0x544] ss:$28 sps:$4 sm:$0xff]  }
  0x4c   :  { %1744 = vmatprep.subr.bf16.mxu1 %v2401_v8  ;;  %v2454_v8 = vld [vmem:[%s3469_s3 + $0x548] ss:$28 sps:$4 sm:$0xff]  }
  0x4f   :  { %1745 = vmatpush1.bf16.msra.mxu1 %v2399_v9  ;;  %v2459_v9 = vld [vmem:[%s3469_s3 + $0x57c] ss:$28 sps:$4 sm:$0xff]  }
  0x50   :  { %1755 = vmatprep.subr.bf16.mxu1 %v2408_v12  ;;  %v2460_v12 = vld [vmem:[%s3469_s3 + $0x580] ss:$28 sps:$4 sm:$0xff]  }
  0xdd   :  { %v131_v20 = vpop.f32.mrb[0].mxu1 }
  0xde   :  { %v132_v21 = vadd.f32 %v131_v20, %v36_v18  ;;  %v133_v22 = vpop.f32.mrb[1].mxu1  ;;  %v2468_v18 = vld [vmem:[%s3469_s3 + $0x5bc] ss:$28 sps:$4 sm:$0xff]  }
  0xdf   :  { %v134_v23 = vadd.f32 %v133_v22, %v40_v19  ;;  %v135_v24 = vpop.f32.mrb[2].mxu1  ;;  %v2463_v19 = vld [vmem:[%s3469_s3 + $0x5b0] ss:$28 sps:$4 sm:$0xff]   ;;  %v2466_v20 = vld [vmem:[%s3469_s3 + $0x5b8] ss:$28 sps:$4 sm:$0xff]  }
  0xe0   :  { %v179_v26 = vmax.f32 %v132_v21, 0.0  ;;  %v136_v27 = vpop.f32.mrb[3].mxu1  ;;  %v2471_v21 = vld [vmem:[%s3469_s3 + $0x5ec] ss:$28 sps:$4 sm:$0xff]   ;;  %v2474_v22 = vld [vmem:[%s3469_s3 + $0x5f4] ss:$28 sps:$4 sm:$0xff]  }
  0xe1   :  { %v180_v28 = vmax.f32 %v134_v23, 0.0  ;;  %v2469_v23 = vld [vmem:[%s3469_s3 + $0x5e8] ss:$28 sps:$4 sm:$0xff]   ;;  %v2472_v24 = vld [vmem:[%s3469_s3 + $0x5f0] ss:$28 sps:$4 sm:$0xff]  }
  0xe2   :  { %v2926_v33 = vpack.c.bf16 %v179_v26, %v179_v26  ;;  %v2477_v26 = vld [vmem:[%s3469_s3 + $0x624] ss:$28 sps:$4 sm:$0xff]   ;;  %v2480_v27 = vld [vmem:[%s3469_s3 + $0x62c] ss:$28 sps:$4 sm:$0xff]  }
  0xe3   :  { %v2915_v29 = vpack.c.bf16 %v180_v28, %v180_v28  ;;  %v43_v28 = vsub.s32 2, %v2899_v14 }
  0xe5   :  { %1664 = vmatprep.mubr.bf16.mxu0 %v2915_v29  ;;  %1746 = vmatprep.mubr.bf16.mxu1 %v2915_v29  ;;  %v2936_v36 = vpop.f32.mrb[4].mxu1 }
  0xe6   :  { %1665 = vmatmul.mubr.bf16.vlgmr.msra.gmra.mrb[0].mxu0 %v2926_v33  ;;  %1747 = vmatmul.mubr.bf16.vlgmr.msra.gmra.mrb[8].mxu1 %v2926_v33  ;;  %v174_v37 = vpop.f32.mrb[5].mxu1 }
  0xe7   :  { %1674 = vmatpush1.bf16.msra.mxu0 %v2403_v30  ;;  %1756 = vmatpush1.bf16.msra.mxu1 %v2406_v31  ;;  %v175_v40 = vadd.f32 %v174_v37, %v48_v32  ;;  %v176_v41 = vpop.f32.mrb[6].mxu1  ;;  %v2475_v30 = vld [vmem:[%s3469_s3 + $0x620] ss:$28 sps:$4 sm:$0xff]   ;;  %v2478_v31 = vld [vmem:[%s3469_s3 + $0x628] ss:$28 sps:$4 sm:$0xff]  }
  0xe8   :  { %1675 = vmatprep.subr.bf16.mxu0 %v2411_v34  ;;  %1757 = vmatprep.subr.bf16.mxu1 %v2414_v35  ;;  %v177_v44 = vpop.f32.mrb[7].mxu1  ;;  %v2483_v32 = vld [vmem:[%s3469_s3 + $0x65c] ss:$28 sps:$4 sm:$0xff]   ;;  %v2486_v34 = vld [vmem:[%s3469_s3 + $0x664] ss:$28 sps:$4 sm:$0xff]   ;;  %v44_v35 = vrot.slane %v2905_v16, %v43_v28 }
  0xe9   :  { %v182_v45 = vmax.f32 %v175_v40, 0.0  ;;  %v2481_v37 = vld [vmem:[%s3469_s3 + $0x658] ss:$28 sps:$4 sm:$0xff]   ;;  %v2487_v41 = vld [vmem:[%s3469_s3 + $0x690] ss:$28 sps:$4 sm:$0xff]  }
  0xea   :  { %v2492_v16 = vld [vmem:[%s3469_s3 + $0x69c] ss:$28 sps:$4 sm:$0xff]   ;;  %v173_v40 = vadd.f32 %v2936_v36, %v44_v35  ;;  %v2498_v36 = vld [vmem:[%s3469_s3 + $0x6d4] ss:$28 sps:$4 sm:$0xff]   ;;  %v2553_v35 = vld [vmem:[%s3469_s3 + $0x408] ss:$28 sps:$4 sm:$0xff]  }
  0xeb   :  { %1676 = vmatpush1.bf16.msra.mxu0 %v2409_v38  ;;  %1758 = vmatpush1.bf16.msra.mxu1 %v2412_v39  ;;  %v2958_v48 = vpack.c.bf16 %v182_v45, %v182_v45  ;;  %v2484_v38 = vld [vmem:[%s3469_s3 + $0x660] ss:$28 sps:$4 sm:$0xff]   ;;  %v2489_v39 = vld [vmem:[%s3469_s3 + $0x694] ss:$28 sps:$4 sm:$0xff]   ;;  %v2493_v45 = vld [vmem:[%s3469_s3 + $0x6c8] ss:$28 sps:$4 sm:$0xff]  }
  0xec   :  { %1677 = vmatprep.subr.bf16.mxu0 %v2417_v42  ;;  %1759 = vmatprep.subr.bf16.mxu1 %v2420_v43  ;;  %v2490_v42 = vld [vmem:[%s3469_s3 + $0x698] ss:$28 sps:$4 sm:$0xff]   ;;  %v2495_v43 = vld [vmem:[%s3469_s3 + $0x6cc] ss:$28 sps:$4 sm:$0xff]   ;;  %v181_v44 = vmax.f32 %v173_v40, 0.0 }
  0xed   :  { %1705 = vmatprep.mubr.bf16.mxu0 %v2958_v48  ;;  %1787 = vmatprep.mubr.bf16.mxu1 %v2958_v48  ;;  %v2561_v40 = vld [vmem:[%s3469_s3 + $0x2b4] ss:$28 sps:$4 sm:$0xff]  }
  0xef   :  { %1678 = vmatpush1.bf16.msra.mxu0 %v2415_v46  ;;  %1760 = vmatpush1.bf16.msra.mxu1 %v2418_v47  ;;  %v2496_v46 = vld [vmem:[%s3469_s3 + $0x6d0] ss:$28 sps:$4 sm:$0xff]  }
  0xf0   :  { %1679 = vmatprep.subr.bf16.mxu0 %v2423_v49  ;;  %1761 = vmatprep.subr.bf16.mxu1 %v2426_v50  ;;  %v2501_v47 = vld [vmem:[%s3469_s3 + $0x14] ss:$28 sps:$4 sm:$0xff]   ;;  %v3129_v50 = vpack.c.bf16 %v181_v44, %v181_v44 }
  0xf1   :  { %v2502_v49 = vld [vmem:[%s3469_s3 + $0x1d8] ss:$28 sps:$4 sm:$0xff]   ;;  %v2567_v44 = vld [vmem:[%s3469_s3 + $0x670] ss:$28 sps:$4 sm:$0xff]  }
  0xf3   :  { %1680 = vmatpush1.bf16.msra.mxu0 %v2421_v51  ;;  %1762 = vmatpush1.bf16.msra.mxu1 %v2424_v52  ;;  %v2499_v51 = vld [vmem:[%s3469_s3 + $0x10] ss:$28 sps:$4 sm:$0xff]   ;;  %v2503_v52 = vld [vmem:[%s3469_s3 + $0x18] ss:$28 sps:$4 sm:$0xff]  }
  0xf4   :  { %1681 = vmatprep.subr.bf16.mxu0 %v2429_v53  ;;  %1763 = vmatprep.subr.bf16.mxu1 %v2432_v54  ;;  %v2506_v53 = vld [vmem:[%s3469_s3 + $0x4c] ss:$28 sps:$4 sm:$0xff]  }
  0xf5   :  { %v2507_v54 = vld [vmem:[%s3469_s3 + $0x210] ss:$28 sps:$4 sm:$0xff]  }
  0xf7   :  { %1682 = vmatpush1.bf16.msra.mxu0 %v2427_v55  ;;  %1764 = vmatpush1.bf16.msra.mxu1 %v2430_v56  ;;  %v2504_v55 = vld [vmem:[%s3469_s3 + $0x48] ss:$28 sps:$4 sm:$0xff]   ;;  %v2508_v56 = vld [vmem:[%s3469_s3 + $0x50] ss:$28 sps:$4 sm:$0xff]  }
  0xf8   :  { %1683 = vmatprep.subr.bf16.mxu0 %v2435_v57  ;;  %1765 = vmatprep.subr.bf16.mxu1 %v2438_v58  ;;  %v2511_v57 = vld [vmem:[%s3469_s3 + $0x84] ss:$28 sps:$4 sm:$0xff]  }
  0xf9   :  { %v2512_v58 = vld [vmem:[%s3469_s3 + $0x248] ss:$28 sps:$4 sm:$0xff]  }
  0xfb   :  { %1684 = vmatpush1.bf16.msra.mxu0 %v2433_v59  ;;  %1766 = vmatpush1.bf16.msra.mxu1 %v2436_v60  ;;  %v2509_v59 = vld [vmem:[%s3469_s3 + $0x80] ss:$28 sps:$4 sm:$0xff]  }
  0xfc   :  { %1685 = vmatprep.subr.bf16.mxu0 %v2441_v61  ;;  %1767 = vmatprep.subr.bf16.mxu1 %v2444_v62  ;;  %v2516_v60 = vld [vmem:[%s3469_s3 + $0xbc] ss:$28 sps:$4 sm:$0xff]  }
  0xfd   :  { %v2517_v61 = vld [vmem:[%s3469_s3 + $0x280] ss:$28 sps:$4 sm:$0xff]   ;;  %v2514_v62 = vld [vmem:[%s3469_s3 + $0xb8] ss:$28 sps:$4 sm:$0xff]  }
  0xff   :  { %1686 = vmatpush1.bf16.msra.mxu0 %v2439_v63  ;;  %1768 = vmatpush1.bf16.msra.mxu1 %v2442_v0  ;;  %v2518_v63 = vld [vmem:[%s3469_s3 + $0xc0] ss:$28 sps:$4 sm:$0xff]   ;;  %v2521_v0 = vld [vmem:[%s3469_s3 + $0xf4] ss:$28 sps:$4 sm:$0xff]  }
 0x100   :  { %1687 = vmatprep.subr.bf16.mxu0 %v2447_v1  ;;  %1769 = vmatprep.subr.bf16.mxu1 %v2450_v2  ;;  %v2522_v1 = vld [vmem:[%s3469_s3 + $0x2b8] ss:$28 sps:$4 sm:$0xff]   ;;  %v2519_v2 = vld [vmem:[%s3469_s3 + $0xf0] ss:$28 sps:$4 sm:$0xff]  }
 0x103   :  { %1688 = vmatpush1.bf16.msra.mxu0 %v2445_v3  ;;  %1770 = vmatpush1.bf16.msra.mxu1 %v2448_v4  ;;  %v2523_v3 = vld [vmem:[%s3469_s3 + $0xf8] ss:$28 sps:$4 sm:$0xff]   ;;  %v2526_v4 = vld [vmem:[%s3469_s3 + $0x12c] ss:$28 sps:$4 sm:$0xff]  }
 0x104   :  { %1689 = vmatprep.subr.bf16.mxu0 %v2453_v5  ;;  %1771 = vmatprep.subr.bf16.mxu1 %v2456_v6  ;;  %v2527_v5 = vld [vmem:[%s3469_s3 + $0x2f0] ss:$28 sps:$4 sm:$0xff]   ;;  %v2524_v6 = vld [vmem:[%s3469_s3 + $0x128] ss:$28 sps:$4 sm:$0xff]  }
 0x107   :  { %1690 = vmatpush1.bf16.msra.mxu0 %v2451_v7  ;;  %1772 = vmatpush1.bf16.msra.mxu1 %v2454_v8  ;;  %v2528_v7 = vld [vmem:[%s3469_s3 + $0x130] ss:$28 sps:$4 sm:$0xff]   ;;  %v2531_v8 = vld [vmem:[%s3469_s3 + $0x164] ss:$28 sps:$4 sm:$0xff]  }
 0x108   :  { %1691 = vmatprep.subr.bf16.mxu0 %v2459_v9  ;;  %1773 = vmatprep.subr.bf16.mxu1 %v2462_v10  ;;  %v2532_v9 = vld [vmem:[%s3469_s3 + $0x328] ss:$28 sps:$4 sm:$0xff]   ;;  %v2529_v10 = vld [vmem:[%s3469_s3 + $0x160] ss:$28 sps:$4 sm:$0xff]  }
 0x10b   :  { %1692 = vmatpush1.bf16.msra.mxu0 %v2457_v11  ;;  %1774 = vmatpush1.bf16.msra.mxu1 %v2460_v12  ;;  %v2533_v11 = vld [vmem:[%s3469_s3 + $0x168] ss:$28 sps:$4 sm:$0xff]   ;;  %v2536_v12 = vld [vmem:[%s3469_s3 + $0x19c] ss:$28 sps:$4 sm:$0xff]  }
 0x10c   :  { %1693 = vmatprep.subr.bf16.mxu0 %v2465_v13  ;;  %1775 = vmatprep.subr.bf16.mxu1 %v2468_v18  ;;  %v2537_v13 = vld [vmem:[%s3469_s3 + $0x360] ss:$28 sps:$4 sm:$0xff]   ;;  %v2534_v18 = vld [vmem:[%s3469_s3 + $0x198] ss:$28 sps:$4 sm:$0xff]  }
 0x10f   :  { %1694 = vmatpush1.bf16.msra.mxu0 %v2463_v19  ;;  %1776 = vmatpush1.bf16.msra.mxu1 %v2466_v20  ;;  %v2538_v19 = vld [vmem:[%s3469_s3 + $0x1a0] ss:$28 sps:$4 sm:$0xff]   ;;  %v2541_v20 = vld [vmem:[%s3469_s3 + $0x1d4] ss:$28 sps:$4 sm:$0xff]  }
 0x110   :  { %1695 = vmatprep.subr.bf16.mxu0 %v2471_v21  ;;  %1777 = vmatprep.subr.bf16.mxu1 %v2474_v22  ;;  %v2542_v21 = vld [vmem:[%s3469_s3 + $0x558] ss:$28 sps:$4 sm:$0xff]   ;;  %v2539_v22 = vld [vmem:[%s3469_s3 + $0x1d0] ss:$28 sps:$4 sm:$0xff]  }
 0x113   :  { %1696 = vmatpush1.bf16.msra.mxu0 %v2469_v23  ;;  %1778 = vmatpush1.bf16.msra.mxu1 %v2472_v24  ;;  %v2543_v23 = vld [vmem:[%s3469_s3 + $0x398] ss:$28 sps:$4 sm:$0xff]   ;;  %v2546_v24 = vld [vmem:[%s3469_s3 + $0x20c] ss:$28 sps:$4 sm:$0xff]  }
 0x114   :  { %1697 = vmatprep.subr.bf16.mxu0 %v2477_v26  ;;  %1779 = vmatprep.subr.bf16.mxu1 %v2480_v27  ;;  %v2547_v26 = vld [vmem:[%s3469_s3 + $0x590] ss:$28 sps:$4 sm:$0xff]   ;;  %v2544_v27 = vld [vmem:[%s3469_s3 + $0x208] ss:$28 sps:$4 sm:$0xff]  }
 0x117   :  { %1698 = vmatpush1.bf16.msra.mxu0 %v2475_v30  ;;  %1780 = vmatpush1.bf16.msra.mxu1 %v2478_v31  ;;  %v2548_v30 = vld [vmem:[%s3469_s3 + $0x3d0] ss:$28 sps:$4 sm:$0xff]   ;;  %v2551_v31 = vld [vmem:[%s3469_s3 + $0x244] ss:$28 sps:$4 sm:$0xff]  }
 0x118   :  { %1699 = vmatprep.subr.bf16.mxu0 %v2483_v32  ;;  %1781 = vmatprep.subr.bf16.mxu1 %v2486_v34  ;;  %v2552_v32 = vld [vmem:[%s3469_s3 + $0x5c8] ss:$28 sps:$4 sm:$0xff]   ;;  %v2549_v34 = vld [vmem:[%s3469_s3 + $0x240] ss:$28 sps:$4 sm:$0xff]  }
 0x11b   :  { %1700 = vmatpush1.bf16.msra.mxu0 %v2481_v37  ;;  %1782 = vmatpush1.bf16.msra.mxu1 %v2484_v38  ;;  %v2556_v37 = vld [vmem:[%s3469_s3 + $0x27c] ss:$28 sps:$4 sm:$0xff]  }
 0x11c   :  { %1701 = vmatprep.subr.bf16.mxu0 %v2489_v39  ;;  %1783 = vmatprep.subr.bf16.mxu1 %v2492_v16  ;;  %v2557_v38 = vld [vmem:[%s3469_s3 + $0x600] ss:$28 sps:$4 sm:$0xff]   ;;  %v2554_v39 = vld [vmem:[%s3469_s3 + $0x278] ss:$28 sps:$4 sm:$0xff]  }
 0x11d   :  { %v2558_v16 = vld [vmem:[%s3469_s3 + $0x440] ss:$28 sps:$4 sm:$0xff]  }
 0x11f   :  { %1702 = vmatpush1.bf16.msra.mxu0 %v2487_v41  ;;  %1784 = vmatpush1.bf16.msra.mxu1 %v2490_v42  ;;  %v2562_v41 = vld [vmem:[%s3469_s3 + $0x638] ss:$28 sps:$4 sm:$0xff]   ;;  %v2559_v42 = vld [vmem:[%s3469_s3 + $0x2b0] ss:$28 sps:$4 sm:$0xff]  }
 0x120   :  { %1703 = vmatprep.subr.bf16.mxu0 %v2495_v43  ;;  %1785 = vmatprep.subr.bf16.mxu1 %v2498_v36  ;;  %v2563_v43 = vld [vmem:[%s3469_s3 + $0x478] ss:$28 sps:$4 sm:$0xff]   ;;  %v2566_v36 = vld [vmem:[%s3469_s3 + $0x2ec] ss:$28 sps:$4 sm:$0xff]  }
 0x123   :  { %1704 = vmatpush1.bf16.msra.mxu0 %v2493_v45  ;;  %1786 = vmatpush1.bf16.msra.mxu1 %v2496_v46  ;;  %v2564_v45 = vld [vmem:[%s3469_s3 + $0x2e8] ss:$28 sps:$4 sm:$0xff]   ;;  %v2568_v46 = vld [vmem:[%s3469_s3 + $0x4b0] ss:$28 sps:$4 sm:$0xff]  }
 0x124   :  { %1796 = vmatprep.subr.bf16.mxu0 %v2501_v47  ;;  %2232 = vmatprep.subr.bf16.mxu1 %v2502_v49  ;;  %v2571_v47 = vld [vmem:[%s3469_s3 + $0x324] ss:$28 sps:$4 sm:$0xff]  }
 0x125   :  { %v2572_v49 = vld [vmem:[%s3469_s3 + $0x6a8] ss:$28 sps:$4 sm:$0xff]  }
 0x126   :  { %1706 = vmatmul.mubr.bf16.vlgmr.msra.gmra.mrb[0].mxu0 %v3129_v50  ;;  %1788 = vmatmul.mubr.bf16.vlgmr.msra.gmra.mrb[8].mxu1 %v3129_v50 }
 0x127   :  { %1797 = vmatpush1.bf16.msra.mxu0 %v2499_v51  ;;  %1828 = vmatprep.mubr.bf16.mxu0 %v2915_v29  ;;  %v2569_v51 = vld [vmem:[%s3469_s3 + $0x320] ss:$28 sps:$4 sm:$0xff]  }
 0x128   :  { %2233 = vmatpush3.bf16.msra.mxu1 %v2503_v52  ;;  %1910 = vmatprep.mubr.bf16.mxu1 %v2915_v29  ;;  %v2513_v29 = vld [vmem:[%s3469_s3 + $0x88] ss:$28 sps:$4 sm:$0xff]  }
 0x129   :  { %1798 = vmatprep.subr.bf16.mxu0 %v2506_v53  ;;  %2234 = vmatprep.subr.bf16.mxu1 %v2507_v54  ;;  %v2573_v52 = vld [vmem:[%s3469_s3 + $0x4e8] ss:$28 sps:$4 sm:$0xff]   ;;  %v2576_v53 = vld [vmem:[%s3469_s3 + $0x35c] ss:$28 sps:$4 sm:$0xff]  }
 0x12a   :  { %v2577_v54 = vld [vmem:[%s3469_s3 + $0x6e0] ss:$28 sps:$4 sm:$0xff]  }
 0x12b   :  { %1799 = vmatpush1.bf16.msra.mxu0 %v2504_v55  ;;  %v2574_v55 = vld [vmem:[%s3469_s3 + $0x358] ss:$28 sps:$4 sm:$0xff]  }
 0x12c   :  { %2235 = vmatpush3.bf16.msra.mxu1 %v2508_v56  ;;  %1800 = vmatprep.subr.bf16.mxu0 %v2511_v57  ;;  %v2578_v56 = vld [vmem:[%s3469_s3 + $0x520] ss:$28 sps:$4 sm:$0xff]   ;;  %v2581_v57 = vld [vmem:[%s3469_s3 + $0x394] ss:$28 sps:$4 sm:$0xff]  }
 0x12d   :  { %2236 = vmatprep.subr.bf16.mxu1 %v2512_v58  ;;  %v2579_v58 = vld [vmem:[%s3469_s3 + $0x390] ss:$28 sps:$4 sm:$0xff]  }
 0x12f   :  { %1801 = vmatpush1.bf16.msra.mxu0 %v2509_v59  ;;  %v2584_v59 = vld [vmem:[%s3469_s3 + $0x3cc] ss:$28 sps:$4 sm:$0xff]  }
 0x130   :  { %2237 = vmatpush3.bf16.msra.mxu1 %v2513_v29  ;;  %1802 = vmatprep.subr.bf16.mxu0 %v2516_v60  ;;  %v2582_v29 = vld [vmem:[%s3469_s3 + $0x3c8] ss:$28 sps:$4 sm:$0xff]  }
 0x131   :  { %2238 = vmatprep.subr.bf16.mxu1 %v2517_v61  ;;  %v2587_v60 = vld [vmem:[%s3469_s3 + $0x404] ss:$28 sps:$4 sm:$0xff]  }
 0x132   :  { %v2585_v61 = vld [vmem:[%s3469_s3 + $0x400] ss:$28 sps:$4 sm:$0xff]  }
 0x133   :  { %1803 = vmatpush1.bf16.msra.mxu0 %v2514_v62  ;;  %v2593_v62 = vld [vmem:[%s3469_s3 + $0x474] ss:$28 sps:$4 sm:$0xff]  }
 0x134   :  { %2239 = vmatpush3.bf16.msra.mxu1 %v2518_v63  ;;  %1804 = vmatprep.subr.bf16.mxu0 %v2521_v0  ;;  %v2591_v63 = vld [vmem:[%s3469_s3 + $0x470] ss:$28 sps:$4 sm:$0xff]  }
 0x135   :  { %2240 = vmatprep.subr.bf16.mxu1 %v2522_v1  ;;  %v2596_v0 = vld [vmem:[%s3469_s3 + $0x4ac] ss:$28 sps:$4 sm:$0xff]  }
 0x136   :  { %v2594_v1 = vld [vmem:[%s3469_s3 + $0x4a8] ss:$28 sps:$4 sm:$0xff]  }
 0x137   :  { %1805 = vmatpush1.bf16.msra.mxu0 %v2519_v2  ;;  %v2599_v2 = vld [vmem:[%s3469_s3 + $0x4e4] ss:$28 sps:$4 sm:$0xff]  }
 0x138   :  { %2241 = vmatpush3.bf16.msra.mxu1 %v2523_v3  ;;  %1806 = vmatprep.subr.bf16.mxu0 %v2526_v4  ;;  %v2597_v3 = vld [vmem:[%s3469_s3 + $0x4e0] ss:$28 sps:$4 sm:$0xff]  }
 0x139   :  { %2242 = vmatprep.subr.bf16.mxu1 %v2527_v5  ;;  %v2602_v4 = vld [vmem:[%s3469_s3 + $0x51c] ss:$28 sps:$4 sm:$0xff]  }
 0x13a   :  { %v2600_v5 = vld [vmem:[%s3469_s3 + $0x518] ss:$28 sps:$4 sm:$0xff]  }
 0x13b   :  { %1807 = vmatpush1.bf16.msra.mxu0 %v2524_v6  ;;  %v2605_v6 = vld [vmem:[%s3469_s3 + $0x554] ss:$28 sps:$4 sm:$0xff]  }
 0x13c   :  { %2243 = vmatpush3.bf16.msra.mxu1 %v2528_v7  ;;  %1808 = vmatprep.subr.bf16.mxu0 %v2531_v8  ;;  %v2603_v7 = vld [vmem:[%s3469_s3 + $0x550] ss:$28 sps:$4 sm:$0xff]  }
 0x13d   :  { %2244 = vmatprep.subr.bf16.mxu1 %v2532_v9  ;;  %v2608_v8 = vld [vmem:[%s3469_s3 + $0x58c] ss:$28 sps:$4 sm:$0xff]  }
 0x13e   :  { %v2606_v9 = vld [vmem:[%s3469_s3 + $0x588] ss:$28 sps:$4 sm:$0xff]  }
 0x13f   :  { %1809 = vmatpush1.bf16.msra.mxu0 %v2529_v10  ;;  %v2611_v10 = vld [vmem:[%s3469_s3 + $0x5c4] ss:$28 sps:$4 sm:$0xff]  }
 0x140   :  { %2245 = vmatpush3.bf16.msra.mxu1 %v2533_v11  ;;  %1810 = vmatprep.subr.bf16.mxu0 %v2536_v12  ;;  %v2609_v11 = vld [vmem:[%s3469_s3 + $0x5c0] ss:$28 sps:$4 sm:$0xff]  }
 0x141   :  { %2246 = vmatprep.subr.bf16.mxu1 %v2537_v13  ;;  %v2614_v12 = vld [vmem:[%s3469_s3 + $0x5fc] ss:$28 sps:$4 sm:$0xff]  }
 0x142   :  { %v2612_v13 = vld [vmem:[%s3469_s3 + $0x5f8] ss:$28 sps:$4 sm:$0xff]  }
 0x143   :  { %1811 = vmatpush1.bf16.msra.mxu0 %v2534_v18  ;;  %v2617_v18 = vld [vmem:[%s3469_s3 + $0x634] ss:$28 sps:$4 sm:$0xff]  }
 0x144   :  { %2247 = vmatpush3.bf16.msra.mxu1 %v2538_v19  ;;  %1812 = vmatprep.subr.bf16.mxu0 %v2541_v20  ;;  %v2615_v19 = vld [vmem:[%s3469_s3 + $0x630] ss:$28 sps:$4 sm:$0xff]  }
 0x145   :  { %2254 = vmatprep.subr.bf16.mxu1 %v2542_v21  ;;  %v2620_v20 = vld [vmem:[%s3469_s3 + $0x66c] ss:$28 sps:$4 sm:$0xff]  }
 0x146   :  { %v2618_v21 = vld [vmem:[%s3469_s3 + $0x668] ss:$28 sps:$4 sm:$0xff]  }
 0x147   :  { %1911 = vmatmul.mubr.bf16.vlgmr.msra.gmra.mrb[12].mxu1 %v2926_v33  ;;  %1813 = vmatpush1.bf16.msra.mxu0 %v2539_v22  ;;  %v2623_v22 = vld [vmem:[%s3469_s3 + $0x6a4] ss:$28 sps:$4 sm:$0xff]  }
 0x148   :  { %2255 = vmatpush3.bf16.msra.mxu1 %v2543_v23  ;;  %1950 = vmatprep.mubr.bf16.mxu1 %v2958_v48  ;;  %v2621_v23 = vld [vmem:[%s3469_s3 + $0x6a0] ss:$28 sps:$4 sm:$0xff]  }
 0x149   :  { %1814 = vmatprep.subr.bf16.mxu0 %v2546_v24  ;;  %2256 = vmatprep.subr.bf16.mxu1 %v2547_v26  ;;  %v2626_v24 = vld [vmem:[%s3469_s3 + $0x6dc] ss:$28 sps:$4 sm:$0xff]  }
 0x14a   :  { %v2624_v26 = vld [vmem:[%s3469_s3 + $0x6d8] ss:$28 sps:$4 sm:$0xff]  }
 0x14b   :  { %1815 = vmatpush1.bf16.msra.mxu0 %v2544_v27  ;;  %v3426_v27 = vld [vmem:[%s3471_s4] sm:$0x7f] }
 0x14c   :  { %2257 = vmatpush3.bf16.msra.mxu1 %v2548_v30  ;;  %1816 = vmatprep.subr.bf16.mxu0 %v2551_v31  ;;  %v448_v30 = vrot.slane %v3426_v27, %v35_v15  ;;  %v456_v31 = vrot.slane %v3426_v27, %v43_v28 }
 0x14d   :  { %2258 = vmatprep.subr.bf16.mxu1 %v2552_v32  ;;  %v452_v32 = vrot.slane %v3426_v27, %v39_v17 }
 0x14f   :  { %1817 = vmatpush1.bf16.msra.mxu0 %v2549_v34 }
 0x150   :  { %2259 = vmatpush3.bf16.msra.mxu1 %v2553_v35  ;;  %1818 = vmatprep.subr.bf16.mxu0 %v2556_v37 }
 0x151   :  { %2260 = vmatprep.subr.bf16.mxu1 %v2557_v38 }
 0x153   :  { %1819 = vmatpush1.bf16.msra.mxu0 %v2554_v39 }
 0x154   :  { %2261 = vmatpush3.bf16.msra.mxu1 %v2558_v16  ;;  %1820 = vmatprep.subr.bf16.mxu0 %v2561_v40 }
 0x155   :  { %2262 = vmatprep.subr.bf16.mxu1 %v2562_v41 }
 0x157   :  { %1821 = vmatpush1.bf16.msra.mxu0 %v2559_v42 }
 0x158   :  { %2263 = vmatpush3.bf16.msra.mxu1 %v2563_v43  ;;  %1822 = vmatprep.subr.bf16.mxu0 %v2566_v36 }
 0x159   :  { %2264 = vmatprep.subr.bf16.mxu1 %v2567_v44 }
 0x15b   :  { %1823 = vmatpush1.bf16.msra.mxu0 %v2564_v45 }
 0x15c   :  { %2265 = vmatpush3.bf16.msra.mxu1 %v2568_v46  ;;  %1824 = vmatprep.subr.bf16.mxu0 %v2571_v47 }
 0x15d   :  { %2266 = vmatprep.subr.bf16.mxu1 %v2572_v49 }
 0x15f   :  { %1825 = vmatpush1.bf16.msra.mxu0 %v2569_v51 }
 0x160   :  { %2267 = vmatpush3.bf16.msra.mxu1 %v2573_v52  ;;  %1826 = vmatprep.subr.bf16.mxu0 %v2576_v53 }
 0x161   :  { %2268 = vmatprep.subr.bf16.mxu1 %v2577_v54 }
 0x163   :  { %1827 = vmatpush1.bf16.msra.mxu0 %v2574_v55 }
 0x164   :  { %2269 = vmatpush3.bf16.msra.mxu1 %v2578_v56  ;;  %1837 = vmatprep.subr.bf16.mxu0 %v2581_v57 }
 0x166   :  { %1829 = vmatmul.mubr.bf16.vlgmr.msra.gmra.mrb[4].mxu0 %v2926_v33  ;;  %v2590_v33 = vld [vmem:[%s3469_s3 + $0x43c] ss:$28 sps:$4 sm:$0xff]  }
 0x167   :  { %1951 = vmatmul.mubr.bf16.vlgmr.msra.gmra.mrb[16].mxu1 %v3129_v50  ;;  %1838 = vmatpush1.bf16.msra.mxu0 %v2579_v58 }
 0x168   :  { %1869 = vmatprep.mubr.bf16.mxu0 %v2958_v48  ;;  %1839 = vmatprep.subr.bf16.mxu0 %v2584_v59  ;;  %v2588_v48 = vld [vmem:[%s3469_s3 + $0x438] ss:$28 sps:$4 sm:$0xff]  }
 0x16b   :  { %1840 = vmatpush1.bf16.msra.mxu0 %v2582_v29 }
 0x16c   :  { %1841 = vmatprep.subr.bf16.mxu0 %v2587_v60 }
 0x16f   :  { %1842 = vmatpush1.bf16.msra.mxu0 %v2585_v61 }
 0x170   :  { %1843 = vmatprep.subr.bf16.mxu0 %v2590_v33 }
 0x173   :  { %1844 = vmatpush1.bf16.msra.mxu0 %v2588_v48  ;;  %v471_v48 = vsub.s32 6, %v2899_v14 }
 0x174   :  { %1845 = vmatprep.subr.bf16.mxu0 %v2593_v62 }
 0x175   :  { %v472_v62 = vrot.slane %v3426_v27, %v471_v48 }
 0x177   :  { %1846 = vmatpush1.bf16.msra.mxu0 %v2591_v63 }
 0x178   :  { %1847 = vmatprep.subr.bf16.mxu0 %v2596_v0 }
 0x17b   :  { %1848 = vmatpush1.bf16.msra.mxu0 %v2594_v1 }
 0x17c   :  { %1849 = vmatprep.subr.bf16.mxu0 %v2599_v2 }
 0x17f   :  { %1850 = vmatpush1.bf16.msra.mxu0 %v2597_v3 }
 0x180   :  { %1851 = vmatprep.subr.bf16.mxu0 %v2602_v4 }
 0x183   :  { %1852 = vmatpush1.bf16.msra.mxu0 %v2600_v5 }
 0x184   :  { %1853 = vmatprep.subr.bf16.mxu0 %v2605_v6 }
 0x187   :  { %1854 = vmatpush1.bf16.msra.mxu0 %v2603_v7 }
 0x188   :  { %1855 = vmatprep.subr.bf16.mxu0 %v2608_v8 }
 0x18b   :  { %1856 = vmatpush1.bf16.msra.mxu0 %v2606_v9 }
 0x18c   :  { %1857 = vmatprep.subr.bf16.mxu0 %v2611_v10  ;;  %v463_v10 = vsub.s32 4, %v2899_v14 }
 0x18f   :  { %1858 = vmatpush1.bf16.msra.mxu0 %v2609_v11  ;;  %v467_v11 = vsub.s32 5, %v2899_v14 }
 0x190   :  { %1859 = vmatprep.subr.bf16.mxu0 %v2614_v12  ;;  %v464_v12 = vrot.slane %v3426_v27, %v463_v10 }
 0x193   :  { %1860 = vmatpush1.bf16.msra.mxu0 %v2612_v13  ;;  %v468_v13 = vrot.slane %v3426_v27, %v467_v11 }
 0x194   :  { %1861 = vmatprep.subr.bf16.mxu0 %v2617_v18 }
 0x197   :  { %1862 = vmatpush1.bf16.msra.mxu0 %v2615_v19 }
 0x198   :  { %1863 = vmatprep.subr.bf16.mxu0 %v2620_v20 }
 0x19b   :  { %1864 = vmatpush1.bf16.msra.mxu0 %v2618_v21 }
 0x19c   :  { %1865 = vmatprep.subr.bf16.mxu0 %v2623_v22 }
 0x19f   :  { %1866 = vmatpush1.bf16.msra.mxu0 %v2621_v23 }
 0x1a0   :  { %1867 = vmatprep.subr.bf16.mxu0 %v2626_v24 }
 0x1a3   :  { %1868 = vmatpush1.bf16.msra.mxu0 %v2624_v26 }
 0x1a6   :  { %1870 = vmatmul.mubr.bf16.vlgmr.msra.gmra.mrb[4].mxu0 %v3129_v50  ;;  %v460_v50 = vrot.slane %v3426_v27, %v47_v25 }
 0x1f9   :  { %v1707_v34 = vpop.f32.mrb[0].mxu0  ;;  %v1789_v35 = vpop.f32.mrb[8].mxu1 }
 0x1fa   :  { %v2276_v37 = vadd.f32 %v1707_v34, %v448_v30  ;;  %v2278_v38 = vadd.f32 %v1789_v35, %v456_v31  ;;  %v1709_v39 = vpop.f32.mrb[1].mxu0  ;;  %v1791_v16 = vpop.f32.mrb[9].mxu1 }
 0x1fb   :  { %v2277_v40 = vadd.f32 %v1709_v39, %v452_v32  ;;  %v2279_v15 = vadd.f32 %v1791_v16, %v460_v50  ;;  %v1711_v41 = vpop.f32.mrb[2].mxu0  ;;  %v1793_v42 = vpop.f32.mrb[10].mxu1 }
 0x1fc   :  { %v1958_v43 = vmul.f32 0.5, %v2276_v37  ;;  %v1960_v28 = vmul.f32 0.5, %v2278_v38  ;;  %v1712_v36 = vpop.f32.mrb[3].mxu0  ;;  %v1794_v44 = vpop.f32.mrb[11].mxu1 }
 0x1fd   :  { %v1959_v45 = vmul.f32 0.5, %v2277_v40  ;;  %v1961_v17 = vmul.f32 0.5, %v2279_v15 }
 0x1fe   :  { %2627 = vtanh.f32 %v1958_v43 }
 0x1ff   :  { %2629 = vtanh.f32 %v1960_v28 }
 0x200   :  { %2631 = vtanh.f32 %v1959_v45 }
 0x201   :  { %2633 = vtanh.f32 %v1961_v17 }
 0x208   :  { %v2628_v25 = vpop.eup %2627 }
 0x209   :  { %v2630_v46 = vpop.eup %2629  ;;  %v1972_v47 = vmul.f32 0.5, %v2628_v25 }
 0x20a   :  { %v2632_v49 = vpop.eup %2631  ;;  %v1974_v51 = vmul.f32 0.5, %v2630_v46 }
 0x20b   :  { %v2634_v52 = vpop.eup %2633  ;;  %v1979_v53 = vadd.f32 0.5, %v1972_v47  ;;  %v1973_v54 = vmul.f32 0.5, %v2632_v49 }
 0x20c   :  { %v1981_v55 = vadd.f32 0.5, %v1974_v51  ;;  %v1975_v56 = vmul.f32 0.5, %v2634_v52 }
 0x20d   :  { %1986 = vst [vmem:[%s3472_s5] sm:$0xff] %v1979_v53  ;;  %v1980_v57 = vadd.f32 0.5, %v1973_v54 }
 0x20e   :  { %1988 = vst [vmem:[%s3472_s5 + $0x10] sm:$0xff] %v1981_v55  ;;  %v1982_v58 = vadd.f32 0.5, %v1975_v56 }
 0x20f   :  { %1987 = vst [vmem:[%s3472_s5 + $0x8] sm:$0xff] %v1980_v57 }
 0x210   :  { %1989 = vst [vmem:[%s3472_s5 + $0x18] sm:$0xff] %v1982_v58 }
 0x21a   :  { %v2248_v59 = vpop.f32.mrb[12].mxu1 }
 0x21b   :  { %v2249_v29 = vpop.f32.mrb[13].mxu1 }
 0x21c   :  { %v2250_v60 = vadd.f32 %v2249_v29, %v2248_v59  ;;  %v2251_v61 = vpop.f32.mrb[14].mxu1 }
 0x21d   :  { %v2252_v33 = vpop.f32.mrb[15].mxu1 }
 0x21e   :  { %v1913_v1 = vadd.f32 %v2250_v60, %v472_v62 }
 0x23a   :  { %v2270_v63 = vpop.f32.mrb[16].mxu1 }
 0x23b   :  { %v2271_v0 = vpop.f32.mrb[17].mxu1 }
 0x23c   :  { %v2272_v2 = vadd.f32 %v2271_v0, %v2270_v63  ;;  %v2273_v3 = vpop.f32.mrb[18].mxu1 }
 0x23d   :  { %v2274_v4 = vpop.f32.mrb[19].mxu1 }
 0x23e   :  { %v1953_v5 = vadd.f32 %v2272_v2, %v1913_v1 }
 0x240   :  { %v1964_v6 = vmul.f32 0.5, %v1953_v5 }
 0x242   :  { %2635 = vtanh.f32 %v1964_v6 }
 0x24c   :  { %v2636_v7 = vpop.eup %2635 }
 0x24d   :  { %v1978_v8 = vmul.f32 0.5, %v2636_v7 }
 0x24f   :  { %v1985_v9 = vadd.f32 0.5, %v1978_v8 }
 0x251   :  { %1993 = vst.msk [vmem:[%s3472_s5 + $0x30] sm:$0xff] %vm1992_vm1, %v1985_v9 }
 0x279   :  { %v1871_v18 = vpop.f32.mrb[4].mxu0 }
 0x27a   :  { %v2280_v19 = vadd.f32 %v1871_v18, %v464_v12  ;;  %v1873_v20 = vpop.f32.mrb[5].mxu0 }
 0x27b   :  { %v2281_v21 = vadd.f32 %v1873_v20, %v468_v13  ;;  %v1875_v22 = vpop.f32.mrb[6].mxu0 }
 0x27c   :  { %v1962_v23 = vmul.f32 0.5, %v2280_v19  ;;  %v1876_v24 = vpop.f32.mrb[7].mxu0 }
 0x27d   :  { %v1963_v26 = vmul.f32 0.5, %v2281_v21 }
 0x27e   :  { %2637 = vtanh.f32 %v1962_v23 }
 0x27f   :  { %2639 = vtanh.f32 %v1963_v26 }
 0x288   :  { %v2638_v30 = vpop.eup %2637 }
 0x289   :  { %v2640_v31 = vpop.eup %2639  ;;  %v1976_v32 = vmul.f32 0.5, %v2638_v30 }
 0x28a   :  { %v1977_v50 = vmul.f32 0.5, %v2640_v31 }
 0x28b   :  { %v1983_v34 = vadd.f32 0.5, %v1976_v32 }
 0x28c   :  { %v1984_v14 = vadd.f32 0.5, %v1977_v50 }
 0x28d   :  { %1990 = vst [vmem:[%s3472_s5 + $0x20] sm:$0xff] %v1983_v34 }
 0x28e   :  { %1991 = vst [vmem:[%s3472_s5 + $0x28] sm:$0xff] %v1984_v14 }

</bundles_post_ra>
